<compile_context>
chip_gen: v6e
topology: v6e:2x2x1
jax: 0.10.0
libtpu: 0.0.40
codegen_flags: <defaults>
</compile_context>

<pallas_src>
import math
import jax
import jax.numpy as jnp
from jax.experimental import pallas as pl
from jax.experimental.pallas import tpu as pltpu


def mnet_kernel(x_ref, w_ref, b_ref, out_ref):
    # x_ref:   (C, Tblk, M, WHb)   one batch elem, Tblk time windows, WHb lane chunk
    # w_ref:   (C, Tc*OC, M)       conv weights, im2col'd (stride-2 / pad-1 baked in)
    # b_ref:   (OC, 1)             bias (f32)
    # out_ref: (Tblk*OC, WHb)      lane-dense output slab
    C, Tblk, M, WHb = x_ref.shape
    OC = b_ref.shape[0]
    Tc = w_ref.shape[1] // OC

    w = w_ref[...]                                                       # tiny, resident
    bias = jnp.broadcast_to(b_ref[...].astype(jnp.float32), (OC, WHb))   # hoisted

    rows = []
    for tw in range(Tblk):        # Tblk is capped small -> bounded static unroll
        # Conv over chirps for every output chirp position at once:
        # one MXU matmul per input channel, f32 accumulation.
        s = jnp.dot(w[0], x_ref[0, tw], preferred_element_type=jnp.float32)
        for c in range(1, C):
            s = s + jnp.dot(w[c], x_ref[c, tw], preferred_element_type=jnp.float32)
        # MaxPool3d over the Tc conv-output chirp positions (rows grouped by t).
        m = s[0:OC, :]
        for t in range(1, Tc):
            m = jnp.maximum(m, s[t * OC:(t + 1) * OC, :])
        rows.append(m + bias)
    # Single dense (Tblk*OC, WHb) store: keeps stores/DMA unmasked (bf16 too).
    out_ref[...] = jnp.concatenate(rows, axis=0).astype(out_ref.dtype)


def mnet_forward(x, weight, bias, *, block_bytes_target=4 << 20, tblk_cap=16):
    """x: (B, 2, win_size, in_chirps, W, H); weight: (OC, 2, 3, 1, 1); bias: (OC,)."""
    B, C, T, M, W, H = x.shape
    assert C == 2
    OC = weight.shape[0]
    Tc = (M + 2 * 1 - (3 - 1) - 1) // 2 + 1      # conv output length along chirps
    WH = W * H
    itemsize = x.dtype.itemsize

    # --- fold conv taps + stride-2 + zero padding into a (C, Tc*OC, M) weight (tiny) ---
    w3 = weight.reshape(OC, C, 3).astype(x.dtype)
    wbig = jnp.zeros((C, Tc * OC, M), dtype=x.dtype)
    for t in range(Tc):
        for k in range(3):
            m_idx = 2 * t - 1 + k                 # pad=1, stride=2 along chirps
            if 0 <= m_idx < M:
                wbig = wbig.at[:, t * OC:(t + 1) * OC, m_idx].set(w3[:, :, k].T)
    b2 = bias.reshape(OC, 1).astype(jnp.float32)

    # --- free reshape only (row-major merge of W,H): no HBM round trips ---
    x5 = x.reshape(B, C, T, M, WH)

    # ---- block-shape selection (HBM-bandwidth bound: big, lane-dense blocks) ----
    per_window_bytes = C * M * WH * itemsize
    tblk = max(1, min(T, tblk_cap, block_bytes_target // max(1, per_window_bytes)))
    if tblk < T:
        # keep the (Tblk*OC) store-row dim sublane-aligned when it isn't the full dim
        step = 8 // math.gcd(OC, 8)
        tblk = max(step, (tblk // step) * step)
    tblk = min(tblk, T)
    nT = pl.cdiv(T, tblk)   # no divisor trap: ragged last block is masked by Pallas

    # If too few blocks for the two v7x TensorCores, split the lane axis (WH)
    # into 128-aligned chunks (DMAs stay dense; also deepens the pipeline).
    WHb = WH
    if B * nT < 4 and WH >= 256:
        want = pl.cdiv(4, B * nT)
        WHb = max(128, 128 * pl.cdiv(pl.cdiv(WH, want), 128))
    nWH = pl.cdiv(WH, WHb)

    # VMEM budget: double-buffered in + out blocks + weights, with headroom.
    # Cap at 48 MiB so it also fits v7x (64 MiB/core); floor above all scoped defaults.
    in_blk = C * tblk * M * WHb * itemsize
    out_blk = tblk * OC * WHb * itemsize
    w_bytes = C * Tc * OC * M * itemsize + OC * 4
    working = 2 * (in_blk + out_blk) + w_bytes
    vmem_limit = int(min(48 << 20, max(32 << 20, working + (8 << 20))))

    cost = pl.CostEstimate(
        flops=2 * B * T * Tc * OC * WH * C * M,
        transcendentals=0,
        bytes_accessed=(B * C * T * M * WH + B * T * OC * WH) * itemsize
                       + C * Tc * OC * M * itemsize + OC * 4,
    )

    out = pl.pallas_call(
        mnet_kernel,
        # (B, T*OC, WH) is the same row-major memory as (B, T, OC, W, H):
        # one dense (Tblk*OC, WHb) slab per grid step.
        out_shape=jax.ShapeDtypeStruct((B, T * OC, WH), x.dtype),
        grid_spec=pltpu.PrefetchScalarGridSpec(
            num_scalar_prefetch=0,
            grid=(B, nT, nWH),
            in_specs=[
                pl.BlockSpec((None, C, tblk, M, WHb),
                             lambda b, tb, wb: (b, 0, tb, 0, wb)),
                pl.BlockSpec((C, Tc * OC, M), lambda b, tb, wb: (0, 0, 0)),
                pl.BlockSpec((OC, 1), lambda b, tb, wb: (0, 0)),
            ],
            out_specs=pl.BlockSpec((None, tblk * OC, WHb),
                                   lambda b, tb, wb: (b, tb, wb)),
        ),
        compiler_params=pltpu.CompilerParams(
            dimension_semantics=("parallel", "parallel", "parallel"),
            vmem_limit_bytes=vmem_limit),
        cost_estimate=cost,
    )(x5, wbig, b2)

    # .squeeze().reshape(B, T, -1, W, H) of the PyTorch module (free reshape here).
    return out.reshape(B, T, OC, W, H)


def mnet_reference(x, weight, bias):
    """Plain-JAX reference replicating the PyTorch forward."""
    B, C, T, M, W, H = x.shape
    OC = weight.shape[0]
    Tc = math.floor((M + 2 - 2 - 1) / 2 + 1)
    xt = jnp.transpose(x, (0, 2, 1, 3, 4, 5)).reshape(B * T, C, M, W, H)
    x_pad = jnp.pad(xt, ((0, 0), (0, 0), (1, 1), (0, 0), (0, 0)))
    w = weight.reshape(OC, C, 3)
    outs = []
    for t in range(Tc):
        win = x_pad[:, :, 2 * t:2 * t + 3]                              # (N, C, 3, W, H)
        outs.append(jnp.einsum('nckwh,ock->nowh', win, w))
    conv = jnp.stack(outs, axis=2) + bias[None, :, None, None, None]
    pooled = jnp.max(conv, axis=2)                                      # MaxPool3d over Tc
    return pooled.reshape(B, T, OC, W, H)


if __name__ == "__main__":
    key = jax.random.PRNGKey(0)
    B, C, T, M, W, H = 2, 2, 4, 8, 16, 16   # batch, in_channels(=2), win_size, in_chirps, W, H
    OC = 8                                   # out_channels

    kx, kw, kb = jax.random.split(key, 3)
    x = jax.random.normal(kx, (B, C, T, M, W, H), dtype=jnp.float32)
    # Deterministic parameter init (Conv3d-like uniform bound = 1/sqrt(fan_in)).
    fan_in = C * 3 * 1 * 1
    bound = 1.0 / math.sqrt(fan_in)
    weight = jax.random.uniform(kw, (OC, C, 3, 1, 1), jnp.float32, -bound, bound)
    bias = jax.random.uniform(kb, (OC,), jnp.float32, -bound, bound)

    out = jax.block_until_ready(mnet_forward(x, weight, bias))
    ref = mnet_reference(x, weight, bias)

    assert out.shape == (B, T, OC, W, H), out.shape
    # f32 MXU path vs XLA einsum differ only by summation order / rounding.
    assert jnp.allclose(out, ref, atol=1e-4, rtol=1e-4), "mismatch vs reference"
    print("KERNEL_OK")
</pallas_src>

<mosaic_0001>
module attributes {stable_mosaic.version = 11 : i64} {
  func.func @mnet_kernel(%arg0: i32, %arg1: i32, %arg2: i32, %arg3: memref<1x2x4x8x128xf32, #tpu.memory_space<vmem>>, %arg4: memref<2x32x8xf32, #tpu.memory_space<vmem>>, %arg5: memref<8x1xf32, #tpu.memory_space<vmem>>, %arg6: memref<1x32x128xf32, #tpu.memory_space<vmem>>) attributes {dimension_semantics = [#tpu.dimension_semantics<parallel>, #tpu.dimension_semantics<parallel>, #tpu.dimension_semantics<parallel>], iteration_bounds = array<i64: 2, 1, 2>, scalar_prefetch = 0 : i64, scratch_operands = 0 : i64, tpu.core_type = #tpu.core_type<tc>, window_params = [{transform_indices = @transform_0, window_bounds = array<i64: 1, 2, 4, 8, 128>}, {pipeline_mode = #tpu.pipeline_mode<synchronous>, transform_indices = @transform_1, window_bounds = array<i64: 2, 32, 8>}, {pipeline_mode = #tpu.pipeline_mode<synchronous>, transform_indices = @transform_2, window_bounds = array<i64: 8, 1>}, {transform_indices = @transform_3, window_bounds = array<i64: 1, 32, 128>}]} {
    %c0 = arith.constant 0 : index
    %c0_0 = arith.constant 0 : index
    %c0_1 = arith.constant 0 : index
    %0 = vector.load %arg4[%c0, %c0_0, %c0_1] : memref<2x32x8xf32, #tpu.memory_space<vmem>>, vector<2x32x8xf32>
    %c0_2 = arith.constant 0 : index
    %c0_3 = arith.constant 0 : index
    %1 = vector.load %arg5[%c0_2, %c0_3] : memref<8x1xf32, #tpu.memory_space<vmem>>, vector<8x1xf32>
    %2 = vector.shape_cast %1 : vector<8x1xf32> to vector<8x1xf32>
    %3 = vector.broadcast %2 : vector<8x1xf32> to vector<8x128xf32>
    %4 = vector.extract_strided_slice %0 {offsets = [0, 0, 0], sizes = [1, 32, 8], strides = [1, 1, 1]} : vector<2x32x8xf32> to vector<1x32x8xf32>
    %5 = vector.shape_cast %4 : vector<1x32x8xf32> to vector<32x8xf32>
    %c0_4 = arith.constant 0 : index
    %c0_5 = arith.constant 0 : index
    %c0_6 = arith.constant 0 : index
    %c0_7 = arith.constant 0 : index
    %c0_8 = arith.constant 0 : index
    %6 = vector.load %arg3[%c0_4, %c0_5, %c0_6, %c0_7, %c0_8] : memref<1x2x4x8x128xf32, #tpu.memory_space<vmem>>, vector<1x1x1x8x128xf32>
    %7 = vector.shape_cast %6 : vector<1x1x1x8x128xf32> to vector<8x128xf32>
    %cst = arith.constant dense<0.000000e+00> : vector<32x128xf32>
    %8 = tpu.matmul %5, %7, %cst {dimension_numbers = #tpu.dot_dimension_numbers<[1], [0], [0], [1], [0, 0, 1, 1], [], []>} : vector<32x8xf32>, vector<8x128xf32>, vector<32x128xf32> -> vector<32x128xf32>
    %9 = vector.extract_strided_slice %0 {offsets = [1, 0, 0], sizes = [1, 32, 8], strides = [1, 1, 1]} : vector<2x32x8xf32> to vector<1x32x8xf32>
    %10 = vector.shape_cast %9 : vector<1x32x8xf32> to vector<32x8xf32>
    %c0_9 = arith.constant 0 : index
    %c1 = arith.constant 1 : index
    %c0_10 = arith.constant 0 : index
    %c0_11 = arith.constant 0 : index
    %c0_12 = arith.constant 0 : index
    %11 = vector.load %arg3[%c0_9, %c1, %c0_10, %c0_11, %c0_12] : memref<1x2x4x8x128xf32, #tpu.memory_space<vmem>>, vector<1x1x1x8x128xf32>
    %12 = vector.shape_cast %11 : vector<1x1x1x8x128xf32> to vector<8x128xf32>
    %cst_13 = arith.constant dense<0.000000e+00> : vector<32x128xf32>
    %13 = tpu.matmul %10, %12, %cst_13 {dimension_numbers = #tpu.dot_dimension_numbers<[1], [0], [0], [1], [0, 0, 1, 1], [], []>} : vector<32x8xf32>, vector<8x128xf32>, vector<32x128xf32> -> vector<32x128xf32>
    %14 = arith.addf %8, %13 : vector<32x128xf32>
    %15 = vector.extract_strided_slice %14 {offsets = [0, 0], sizes = [8, 128], strides = [1, 1]} : vector<32x128xf32> to vector<8x128xf32>
    %16 = vector.extract_strided_slice %14 {offsets = [8, 0], sizes = [8, 128], strides = [1, 1]} : vector<32x128xf32> to vector<8x128xf32>
    %17 = arith.maximumf %15, %16 : vector<8x128xf32>
    %18 = vector.extract_strided_slice %14 {offsets = [16, 0], sizes = [8, 128], strides = [1, 1]} : vector<32x128xf32> to vector<8x128xf32>
    %19 = arith.maximumf %17, %18 : vector<8x128xf32>
    %20 = vector.extract_strided_slice %14 {offsets = [24, 0], sizes = [8, 128], strides = [1, 1]} : vector<32x128xf32> to vector<8x128xf32>
    %21 = arith.maximumf %19, %20 : vector<8x128xf32>
    %22 = arith.addf %21, %3 : vector<8x128xf32>
    %23 = vector.extract_strided_slice %0 {offsets = [0, 0, 0], sizes = [1, 32, 8], strides = [1, 1, 1]} : vector<2x32x8xf32> to vector<1x32x8xf32>
    %24 = vector.shape_cast %23 : vector<1x32x8xf32> to vector<32x8xf32>
    %c0_14 = arith.constant 0 : index
    %c0_15 = arith.constant 0 : index
    %c1_16 = arith.constant 1 : index
    %c0_17 = arith.constant 0 : index
    %c0_18 = arith.constant 0 : index
    %25 = vector.load %arg3[%c0_14, %c0_15, %c1_16, %c0_17, %c0_18] : memref<1x2x4x8x128xf32, #tpu.memory_space<vmem>>, vector<1x1x1x8x128xf32>
    %26 = vector.shape_cast %25 : vector<1x1x1x8x128xf32> to vector<8x128xf32>
    %cst_19 = arith.constant dense<0.000000e+00> : vector<32x128xf32>
    %27 = tpu.matmul %24, %26, %cst_19 {dimension_numbers = #tpu.dot_dimension_numbers<[1], [0], [0], [1], [0, 0, 1, 1], [], []>} : vector<32x8xf32>, vector<8x128xf32>, vector<32x128xf32> -> vector<32x128xf32>
    %28 = vector.extract_strided_slice %0 {offsets = [1, 0, 0], sizes = [1, 32, 8], strides = [1, 1, 1]} : vector<2x32x8xf32> to vector<1x32x8xf32>
    %29 = vector.shape_cast %28 : vector<1x32x8xf32> to vector<32x8xf32>
    %c0_20 = arith.constant 0 : index
    %c1_21 = arith.constant 1 : index
    %c1_22 = arith.constant 1 : index
    %c0_23 = arith.constant 0 : index
    %c0_24 = arith.constant 0 : index
    %30 = vector.load %arg3[%c0_20, %c1_21, %c1_22, %c0_23, %c0_24] : memref<1x2x4x8x128xf32, #tpu.memory_space<vmem>>, vector<1x1x1x8x128xf32>
    %31 = vector.shape_cast %30 : vector<1x1x1x8x128xf32> to vector<8x128xf32>
    %cst_25 = arith.constant dense<0.000000e+00> : vector<32x128xf32>
    %32 = tpu.matmul %29, %31, %cst_25 {dimension_numbers = #tpu.dot_dimension_numbers<[1], [0], [0], [1], [0, 0, 1, 1], [], []>} : vector<32x8xf32>, vector<8x128xf32>, vector<32x128xf32> -> vector<32x128xf32>
    %33 = arith.addf %27, %32 : vector<32x128xf32>
    %34 = vector.extract_strided_slice %33 {offsets = [0, 0], sizes = [8, 128], strides = [1, 1]} : vector<32x128xf32> to vector<8x128xf32>
    %35 = vector.extract_strided_slice %33 {offsets = [8, 0], sizes = [8, 128], strides = [1, 1]} : vector<32x128xf32> to vector<8x128xf32>
    %36 = arith.maximumf %34, %35 : vector<8x128xf32>
    %37 = vector.extract_strided_slice %33 {offsets = [16, 0], sizes = [8, 128], strides = [1, 1]} : vector<32x128xf32> to vector<8x128xf32>
    %38 = arith.maximumf %36, %37 : vector<8x128xf32>
    %39 = vector.extract_strided_slice %33 {offsets = [24, 0], sizes = [8, 128], strides = [1, 1]} : vector<32x128xf32> to vector<8x128xf32>
    %40 = arith.maximumf %38, %39 : vector<8x128xf32>
    %41 = arith.addf %40, %3 : vector<8x128xf32>
    %42 = vector.extract_strided_slice %0 {offsets = [0, 0, 0], sizes = [1, 32, 8], strides = [1, 1, 1]} : vector<2x32x8xf32> to vector<1x32x8xf32>
    %43 = vector.shape_cast %42 : vector<1x32x8xf32> to vector<32x8xf32>
    %c0_26 = arith.constant 0 : index
    %c0_27 = arith.constant 0 : index
    %c2 = arith.constant 2 : index
    %c0_28 = arith.constant 0 : index
    %c0_29 = arith.constant 0 : index
    %44 = vector.load %arg3[%c0_26, %c0_27, %c2, %c0_28, %c0_29] : memref<1x2x4x8x128xf32, #tpu.memory_space<vmem>>, vector<1x1x1x8x128xf32>
    %45 = vector.shape_cast %44 : vector<1x1x1x8x128xf32> to vector<8x128xf32>
    %cst_30 = arith.constant dense<0.000000e+00> : vector<32x128xf32>
    %46 = tpu.matmul %43, %45, %cst_30 {dimension_numbers = #tpu.dot_dimension_numbers<[1], [0], [0], [1], [0, 0, 1, 1], [], []>} : vector<32x8xf32>, vector<8x128xf32>, vector<32x128xf32> -> vector<32x128xf32>
    %47 = vector.extract_strided_slice %0 {offsets = [1, 0, 0], sizes = [1, 32, 8], strides = [1, 1, 1]} : vector<2x32x8xf32> to vector<1x32x8xf32>
    %48 = vector.shape_cast %47 : vector<1x32x8xf32> to vector<32x8xf32>
    %c0_31 = arith.constant 0 : index
    %c1_32 = arith.constant 1 : index
    %c2_33 = arith.constant 2 : index
    %c0_34 = arith.constant 0 : index
    %c0_35 = arith.constant 0 : index
    %49 = vector.load %arg3[%c0_31, %c1_32, %c2_33, %c0_34, %c0_35] : memref<1x2x4x8x128xf32, #tpu.memory_space<vmem>>, vector<1x1x1x8x128xf32>
    %50 = vector.shape_cast %49 : vector<1x1x1x8x128xf32> to vector<8x128xf32>
    %cst_36 = arith.constant dense<0.000000e+00> : vector<32x128xf32>
    %51 = tpu.matmul %48, %50, %cst_36 {dimension_numbers = #tpu.dot_dimension_numbers<[1], [0], [0], [1], [0, 0, 1, 1], [], []>} : vector<32x8xf32>, vector<8x128xf32>, vector<32x128xf32> -> vector<32x128xf32>
    %52 = arith.addf %46, %51 : vector<32x128xf32>
    %53 = vector.extract_strided_slice %52 {offsets = [0, 0], sizes = [8, 128], strides = [1, 1]} : vector<32x128xf32> to vector<8x128xf32>
    %54 = vector.extract_strided_slice %52 {offsets = [8, 0], sizes = [8, 128], strides = [1, 1]} : vector<32x128xf32> to vector<8x128xf32>
    %55 = arith.maximumf %53, %54 : vector<8x128xf32>
    %56 = vector.extract_strided_slice %52 {offsets = [16, 0], sizes = [8, 128], strides = [1, 1]} : vector<32x128xf32> to vector<8x128xf32>
    %57 = arith.maximumf %55, %56 : vector<8x128xf32>
    %58 = vector.extract_strided_slice %52 {offsets = [24, 0], sizes = [8, 128], strides = [1, 1]} : vector<32x128xf32> to vector<8x128xf32>
    %59 = arith.maximumf %57, %58 : vector<8x128xf32>
    %60 = arith.addf %59, %3 : vector<8x128xf32>
    %61 = vector.extract_strided_slice %0 {offsets = [0, 0, 0], sizes = [1, 32, 8], strides = [1, 1, 1]} : vector<2x32x8xf32> to vector<1x32x8xf32>
    %62 = vector.shape_cast %61 : vector<1x32x8xf32> to vector<32x8xf32>
    %c0_37 = arith.constant 0 : index
    %c0_38 = arith.constant 0 : index
    %c3 = arith.constant 3 : index
    %c0_39 = arith.constant 0 : index
    %c0_40 = arith.constant 0 : index
    %63 = vector.load %arg3[%c0_37, %c0_38, %c3, %c0_39, %c0_40] : memref<1x2x4x8x128xf32, #tpu.memory_space<vmem>>, vector<1x1x1x8x128xf32>
    %64 = vector.shape_cast %63 : vector<1x1x1x8x128xf32> to vector<8x128xf32>
    %cst_41 = arith.constant dense<0.000000e+00> : vector<32x128xf32>
    %65 = tpu.matmul %62, %64, %cst_41 {dimension_numbers = #tpu.dot_dimension_numbers<[1], [0], [0], [1], [0, 0, 1, 1], [], []>} : vector<32x8xf32>, vector<8x128xf32>, vector<32x128xf32> -> vector<32x128xf32>
    %66 = vector.extract_strided_slice %0 {offsets = [1, 0, 0], sizes = [1, 32, 8], strides = [1, 1, 1]} : vector<2x32x8xf32> to vector<1x32x8xf32>
    %67 = vector.shape_cast %66 : vector<1x32x8xf32> to vector<32x8xf32>
    %c0_42 = arith.constant 0 : index
    %c1_43 = arith.constant 1 : index
    %c3_44 = arith.constant 3 : index
    %c0_45 = arith.constant 0 : index
    %c0_46 = arith.constant 0 : index
    %68 = vector.load %arg3[%c0_42, %c1_43, %c3_44, %c0_45, %c0_46] : memref<1x2x4x8x128xf32, #tpu.memory_space<vmem>>, vector<1x1x1x8x128xf32>
    %69 = vector.shape_cast %68 : vector<1x1x1x8x128xf32> to vector<8x128xf32>
    %cst_47 = arith.constant dense<0.000000e+00> : vector<32x128xf32>
    %70 = tpu.matmul %67, %69, %cst_47 {dimension_numbers = #tpu.dot_dimension_numbers<[1], [0], [0], [1], [0, 0, 1, 1], [], []>} : vector<32x8xf32>, vector<8x128xf32>, vector<32x128xf32> -> vector<32x128xf32>
    %71 = arith.addf %65, %70 : vector<32x128xf32>
    %72 = vector.extract_strided_slice %71 {offsets = [0, 0], sizes = [8, 128], strides = [1, 1]} : vector<32x128xf32> to vector<8x128xf32>
    %73 = vector.extract_strided_slice %71 {offsets = [8, 0], sizes = [8, 128], strides = [1, 1]} : vector<32x128xf32> to vector<8x128xf32>
    %74 = arith.maximumf %72, %73 : vector<8x128xf32>
    %75 = vector.extract_strided_slice %71 {offsets = [16, 0], sizes = [8, 128], strides = [1, 1]} : vector<32x128xf32> to vector<8x128xf32>
    %76 = arith.maximumf %74, %75 : vector<8x128xf32>
    %77 = vector.extract_strided_slice %71 {offsets = [24, 0], sizes = [8, 128], strides = [1, 1]} : vector<32x128xf32> to vector<8x128xf32>
    %78 = arith.maximumf %76, %77 : vector<8x128xf32>
    %79 = arith.addf %78, %3 : vector<8x128xf32>
    %80 = tpu.concatenate %22, %41, %60, %79 in 0 : vector<8x128xf32>, vector<8x128xf32>, vector<8x128xf32>, vector<8x128xf32> -> vector<32x128xf32>
    %c0_48 = arith.constant 0 : index
    %c0_49 = arith.constant 0 : index
    %c0_50 = arith.constant 0 : index
    %81 = vector.load %arg6[%c0_48, %c0_49, %c0_50] : memref<1x32x128xf32, #tpu.memory_space<vmem>>, vector<1x32x128xf32>
    %82 = vector.shape_cast %81 : vector<1x32x128xf32> to vector<32x128xf32>
    %83 = vector.shape_cast %80 : vector<32x128xf32> to vector<1x32x128xf32>
    tpu.vector_store %arg6[%c0_48, %c0_49, %c0_50], %83 {strides = array<i32>} : memref<1x32x128xf32, #tpu.memory_space<vmem>>, vector<1x32x128xf32>,
    return
  }
  func.func @transform_0(%arg0: i32, %arg1: i32, %arg2: i32) -> (i32, i32, i32, i32, i32) {
    %c0_i32 = arith.constant 0 : i32
    %c0_i32_0 = arith.constant 0 : i32
    %c0_i32_1 = arith.constant 0 : i32
    return %arg0, %c0_i32, %arg1, %c0_i32_0, %arg2 : i32, i32, i32, i32, i32
  }
  func.func @transform_1(%arg0: i32, %arg1: i32, %arg2: i32) -> (i32, i32, i32) {
    %c0_i32 = arith.constant 0 : i32
    %c0_i32_0 = arith.constant 0 : i32
    %c0_i32_1 = arith.constant 0 : i32
    %c0_i32_2 = arith.constant 0 : i32
    return %c0_i32, %c0_i32_0, %c0_i32_1 : i32, i32, i32
  }
  func.func @transform_2(%arg0: i32, %arg1: i32, %arg2: i32) -> (i32, i32) {
    %c0_i32 = arith.constant 0 : i32
    %c0_i32_0 = arith.constant 0 : i32
    %c0_i32_1 = arith.constant 0 : i32
    return %c0_i32, %c0_i32_0 : i32, i32
  }
  func.func @transform_3(%arg0: i32, %arg1: i32, %arg2: i32) -> (i32, i32, i32) {
    %c0_i32 = arith.constant 0 : i32
    return %arg0, %arg1, %arg2 : i32, i32, i32
  }
}

</mosaic_0001>

<bundles_post_ra>
// kernel: tpu_custom_call.1
= control target key start
LH: loop header
LB: loop body
LE: loop exit
PB: predicated region body
PF: predicated region fallthrough
CT: control target
= control target key end

     0   :  { %8 = vsyncpa [#allocation3], 0  ;;  %s1731_s0 = inlined_call_operand.hbm [shape: f32[2,2,4,8,256], index: 0, kind: input, shape index: {}]   ;;  %s1732_s1 = inlined_call_operand.vmem [shape: f32[2,32,8], index: 1, kind: input, shape index: {}]   ;;  %s1733_s2 = inlined_call_operand.vmem [shape: f32[8,1], index: 2, kind: input, shape index: {}]   ;;  %s1734_s3 = inlined_call_operand.hbm [shape: f32[2,32,256], index: 3, kind: output, shape index: {}]  }
   0x1   :  { %10 = vsyncpa [#allocation3 + $0x1], 0 }
   0x2   :  { %11 = vsyncpa [#allocation4], 0 }
   0x3   :  { %13 = vsyncpa [#allocation4 + $0x1], 0  ;;  %s1488_s12 = smov 0   ;;  %s1490_s13 = smov 0  }
   0x4   :  { %s1492_s14 = smov 0   ;;  %s1494_s15 = smov 0  }
   0x5   :  { %s1496_s16 = smov 0   ;;  %s1498_s17 = smov 0  }
   0x6   :  { %s1500_s18 = smov 0   ;;  %s1502_s19 = smov 0  }
   0x7 LB: > { %s1089_s20 = sadd.s32 4294967295, %s1457_s19   ;;  %s1090_s21 = sadd.s32 4294967294, %s1457_s19   ;;  %s1457_s19 = sphi %s1502_s19, %s19_s19   ;;  %s1453_s18 = sphi %s1500_s18, %s1752_s18   ;;  %s1449_s17 = sphi %s1498_s17, %s1751_s17   ;;  %s1445_s16 = sphi %s1496_s16, %s1750_s16   ;;  %s1441_s15 = sphi %s1494_s15, %s1749_s15   ;;  %s1437_s14 = sphi %s1492_s14, %s1748_s14   ;;  %s1433_s13 = sphi %s1490_s13, %s1747_s13   ;;  %s1429_s12 = sphi %s1488_s12, %s1746_s12  }
   0x8   : > { %s31_s22 = sadd.s32 1, %s1449_s17  ;;  %s38_s23 = sadd.s32 1, %s1453_s18 }
   0x9   : > { %p32_p0 = scmp.ge.s32.totalorder %s31_s22, 2  ;;  %s49_s24 = sadd.s32 1, %s1437_s14 }
   0xa   : > { %p56_p1 = scmp.ne.s32.totalorder %s1437_s14, %s1433_s13  ;;  %p57_p2 = scmp.eq.s32.totalorder %s1457_s19, 0 }
   0xb   : > { %s1754_s22 = smov (%p32_p0, %s31_s22), 0  ;;  %s1756_s23 = smov (!%p32_p0, %s38_s23), %s1453_s18 }
   0xc   : > { %1737 = sst [smem:[#allocation8_spill]] %s1754_s22  ;;  %s45_s25 = ssub.s32 %s1449_s17, %s1754_s22 }
   0xd   : > { %p1541_p3 = por %p57_p2, %p56_p1  ;;  %p40_p4 = scmp.ge.s32.totalorder %s1756_s23, 2 }
   0xe   : > { %p62_p5 = scmp.ne.s32.totalorder %s1433_s13, %s1429_s12  ;;  %p63_p6 = scmp.eq.s32.totalorder %s1089_s20, 0 }
   0xf   : > { %p132_p7 = scmp.eq.s32.totalorder %s1089_s20, 3  ;;  %s1758_s23 = smov (%p40_p4, %s1756_s23), 0 }
  0x10   : > { %1739 = sst [smem:[#allocation9_spill]] %s1758_s23  ;;  %p1549_p8 = por %p63_p6, %p62_p5 }
  0x11   : > { %p1553_p9 = por %p132_p7, %p56_p1  ;;  %s42_s29 = ssub.s32 %s1453_s18, %s1758_s23 }
  0x12   : > { %p138_p10 = scmp.eq.s32.totalorder %s1090_s21, 3  ;;  %s46_s30 = sor.u32 %s45_s25, %s42_s29 }
  0x13   : > { %p47_p11 = scmp.eq.s32.totalorder %s46_s30, 0  ;;  %p1259_p13 = scmp.lt.s32.totalorder %s1457_s19, 4 }
  0x14   : > { %p1559_p12 = por %p138_p10, %p62_p5  ;;  %s164_s5 = sand.u32 1, %s1437_s14  }
  0x15   : > { %s1566_s6 = scalar_select %p47_p11, %s1437_s14, %s49_s24  }
  0x16   : > { %s1093_s7 = sshll.u32 %s164_s5, 6  ;;  %s1094_s8 = sshll.u32 %s1453_s18, 4 }
  0x17   : > { %s176_s9 = sadd.s32 %s1449_s17, %s1094_s8  ;;  %s168_s10 = scalar_lea.vmem [#allocation2], %s1093_s7 }
  0x18   : > { %s179_s11 = sshll.u32 %s168_s10, 4  ;;  %s1095_s20 = sshll.u32 %s176_s9, 7  ;;  %s180_s11 = int_to_ptr.vmem [resolvable:$true] %s179_s11 }
  0x19   : > { %s178_s21 = scalar_lea.hbm %s1731_s0, %s1095_s20  ;;  %p1575_p0 = pnand %p1259_p13, %p1541_p3 }
  0x1a   : > { %s165_s29 = scalar_lea.sflag [#allocation3], %s164_s5  ;;  %s1346_s24 = scalar_lea.vmem %s180_s11, 1024 }
  0x1b   : > { %p1335_p1 = pneg %p1575_p0  ;;  %p1347_p2 = scmp.ne.s32.totalorder %s180_s11, %s1346_s24 }
  0x1c   : > { %s1459_s30 = smov [#allocation2]  }
  0x1d   : > { %p1349_p4 = pnand %p1347_p2, %p1335_p1  ;;  %s1351_s7 = sshll.u32 %s1459_s30, 4  ;;  %s1352_s7 = int_to_ptr.vmem [resolvable:$false] %s1351_s7 }
  0x1e   : > { %s1353_s8 = scalar_lea.vmem %s1352_s7, 2048  ;;  %p1354_p6 = scmp.lt.s32.totalorder %s180_s11, %s1352_s7 }
  0x1f   : > { %p1350_p5 = pneg %p1349_p4  ;;  %p1355_p7 = scmp.lt.s32.totalorder %s1353_s8, %s1346_s24 }
  0x21   : > { %p1356_p10 = por %p1355_p7, %p1354_p6 }
  0x23   : > { %p1357_p11 = pnand %p1356_p10, %p1350_p5 }
  0x25   : > { %1360 = shalt.err (!%p1357_p11)
}
  0x26   : > { %s1460_s22 = smov 256   ;;  %s1461_s23 = smov 128  }
  0x27   : > { %s1462_s26 = smov 8   ;;  %p1096_p3 = scmp.ge.s32.totalorder %s1457_s19, 1 }
  0x28   : > { %1254 = dma.hbm_to_vmem [thread:$0]  (!%p1575_p0), %s178_s21, 1024, %s180_s11, %s165_s29, %s1460_s22, %s1461_s23, %s1462_s26  }
  0x29   : > { %p187_p13 = scmp.lt.s32.totalorder %s1457_s19, 5 }
  0x2b   : > { %p188_p1 = pnand %p1096_p3, %p187_p13 }
  0x2c   : > { %s1586_s5 = sand.u32 (!%p188_p1), 1, %s1433_s13  }
  0x2d   : > { %191 = sbr.rel (%p188_p1) target bundleno = 302 (0x12e), region = 32  ;;  %s1097_s9 = sshll.u32 (!%p188_p1), %s1586_s5, 6 }
  0x2e   : > { %s194_s10 = scalar_lea.sflag (!%p188_p1), [#allocation3], %s1586_s5  ;;  %s1590_s20 = scalar_lea.vmem (!%p188_p1), [#allocation2], %s1097_s9 }
  0x32   : > { %1420 = dma.done.wait (%p1549_p8), %s194_s10, 1024  }
  0x33   : > { %1422 = vsyncadd (%p1549_p8), %s194_s10, 4294966272  ;;  %v1463_v0 = vmov 0   ;;  %vm239_vm0 = vcmask 64512   ;;  %v1099_v1 = vld [vmem:[%s1590_s20 + $0x20] sm:$0xff]  ;;  %v227_v5 = vld [vmem:[%s1732_s1 + $0x28] sm:$0xff]  ;;  %s1139_s24 = sshll.u32 %s1445_s16, 3 }
  0x34   : > { %1332 = vset.pattern.permute.xlu0 %v1463_v0  ;;  %v236_v2 = vld [vmem:[%s1590_s20] sm:$0xff]  ;;  %1183 = vmatprep.subr.mxu0 %v1099_v1  ;;  %v223_v6 = vld [vmem:[%s1732_s1 + $0x8] sm:$0xff]  ;;  %v228_v9 = vld [vmem:[%s1732_s1 + $0x30] sm:$0xff]  ;;  %s991_s30 = sadd.s32 %s1441_s15, %s1139_s24  ;;  %s977_s15 = scalar_lea.sflag [#allocation4], %s1586_s5 }
  0x35   : > { %v226_v3 = vld [vmem:[%s1732_s1 + $0x20] sm:$0xff]  ;;  %1191 = vmatprep.subr.mxu1 %v236_v2  ;;  %1184 = vmatpush3.msra.mxu0 %v1099_v1  ;;  %v1109_v7 = vld [vmem:[%s1590_s20 + $0x28] sm:$0xff]  ;;  %v224_v10 = vld [vmem:[%s1732_s1 + $0x10] sm:$0xff]  ;;  %s1140_s8 = sshll.u32 %s991_s30, 7  ;;  %s1464_s9 = smov [#allocation5]  }
  0x36   : > { %v222_v4 = vld [vmem:[%s1732_s1] sm:$0xff]  ;;  %1185 = vmatprep.mubr.msk.f32.mxu0 %vm239_vm0, %v226_v3  ;;  %v1108_v8 = vld [vmem:[%s1590_s20 + $0x8] sm:$0xff]  ;;  %1192 = vmatpush3.msra.mxu1 %v236_v2  ;;  %v229_v11 = vld [vmem:[%s1732_s1 + $0x38] sm:$0xff]  ;;  %s1677_s23 = scalar_lea.hbm %s1734_s3, %s1140_s8  ;;  %s1365_s10 = sshll.u32 %s1464_s9, 4  ;;  %s1366_s10 = int_to_ptr.vmem [resolvable:$false] %s1365_s10 }
  0x37   : > { %1193 = vmatprep.mubr.msk.f32.mxu1 %vm239_vm0, %v222_v4  ;;  %1186 = vmatmul.mubr.msk.f32.vlgmr.msra.gmra.mxu0 %vm239_vm0, %v227_v5  ;;  %v225_v12 = vld [vmem:[%s1732_s1 + $0x18] sm:$0xff]  ;;  %v1119_v13 = vld [vmem:[%s1590_s20 + $0x30] sm:$0xff]  ;;  %v230_v15 = vld [vmem:[%s1733_s2] sm:$0xff]  ;;  %s1367_s11 = scalar_lea.vmem %s1366_s10, 1024 }
  0x38   : > { %1194 = vmatmul.mubr.msk.f32.vlgmr.msra.gmra.mxu1 %vm239_vm0, %v223_v6  ;;  %1199 = vmatprep.subr.mxu0 %v1109_v7  ;;  %v1118_v14 = vld [vmem:[%s1590_s20 + $0x10] sm:$0xff]  ;;  %v1129_v16 = vld [vmem:[%s1590_s20 + $0x38] sm:$0xff] }
  0x39   : > { %1207 = vmatprep.subr.mxu1 %v1108_v8  ;;  %1200 = vmatpush3.msra.mxu0 %v1109_v7  ;;  %v1128_v17 = vld [vmem:[%s1590_s20 + $0x18] sm:$0xff]  ;;  %s1098_s20 = sshll.u32 %s1586_s5, 5 }
  0x3a   : > { %1208 = vmatpush3.msra.mxu1 %v1108_v8  ;;  %1188 = vmatprep.mubr.msk.f32.mxu0 %vm239_vm0, %v228_v9  ;;  %s1664_s27 = scalar_lea.vmem [#allocation5], %s1098_s20 }
  0x3b   : > { %1196 = vmatprep.mubr.msk.f32.mxu1 %vm239_vm0, %v224_v10  ;;  %1189 = vmatmul.mubr.msk.f32.gmra.mxu0 %vm239_vm0, %v229_v11  ;;  %s994_s7 = sshll.u32 %s1664_s27, 4  ;;  %s1672_s7 = int_to_ptr.vmem [resolvable:$true] %s994_s7 }
  0x3c   : > { %1197 = vmatmul.mubr.msk.f32.gmra.mxu1 %vm239_vm0, %v225_v12  ;;  %1201 = vmatprep.mubr.msk.f32.mxu0 %vm239_vm0, %v226_v3  ;;  %s1361_s26 = scalar_lea.vmem %s1672_s7, 512  ;;  %p1368_p4 = scmp.lt.s32.totalorder %s1672_s7, %s1366_s10 }
  0x3d   : > { %1209 = vmatprep.mubr.msk.f32.mxu1 %vm239_vm0, %v222_v4  ;;  %1215 = vmatprep.subr.mxu0 %v1119_v13  ;;  %p1362_p8 = scmp.ne.s32.totalorder %s1672_s7, %s1361_s26  ;;  %p1369_p5 = scmp.lt.s32.totalorder %s1367_s11, %s1361_s26 }
  0x3e   : > { %1223 = vmatprep.subr.mxu1 %v1118_v14  ;;  %233 = vperm.xlu0 %1332, %v230_v15  }
  0x3f   : > { %1202 = vmatmul.mubr.msk.f32.vlgmr.msra.gmra.mxu0 %vm239_vm0, %v227_v5  ;;  %p1363_p0 = pnand %p1362_p8, %p1553_p9  ;;  %p1370_p6 = por %p1369_p5, %p1368_p4 }
  0x40   : > { %1210 = vmatmul.mubr.msk.f32.vlgmr.msra.gmra.mxu1 %vm239_vm0, %v223_v6  ;;  %1216 = vmatpush3.msra.mxu0 %v1119_v13 }
  0x41   : > { %1224 = vmatpush3.msra.mxu1 %v1118_v14  ;;  %1204 = vmatprep.mubr.msk.f32.mxu0 %vm239_vm0, %v228_v9  ;;  %p1364_p2 = pneg %p1363_p0 }
  0x42   : > { %1212 = vmatprep.mubr.msk.f32.mxu1 %vm239_vm0, %v224_v10  ;;  %1231 = vmatprep.subr.mxu0 %v1129_v16 }
  0x43   : > { %1239 = vmatprep.subr.mxu1 %v1128_v17  ;;  %1205 = vmatmul.mubr.msk.f32.gmra.mxu0 %vm239_vm0, %v229_v11  ;;  %p1371_p7 = pnand %p1370_p6, %p1364_p2 }
  0x44   : > { %1213 = vmatmul.mubr.msk.f32.gmra.mxu1 %vm239_vm0, %v225_v12  ;;  %1217 = vmatprep.mubr.msk.f32.mxu0 %vm239_vm0, %v226_v3 }
  0x45   : > { %1225 = vmatprep.mubr.msk.f32.mxu1 %vm239_vm0, %v222_v4 }
  0x47   : > { %1218 = vmatmul.mubr.msk.f32.vlgmr.msra.gmra.mxu0 %vm239_vm0, %v227_v5 }
  0x48   : > { %1226 = vmatmul.mubr.msk.f32.vlgmr.msra.gmra.mxu1 %vm239_vm0, %v223_v6  ;;  %1232 = vmatpush3.msra.mxu0 %v1129_v16 }
  0x49   : > { %1240 = vmatpush3.msra.mxu1 %v1128_v17  ;;  %1220 = vmatprep.mubr.msk.f32.mxu0 %vm239_vm0, %v228_v9 }
  0x4a   : > { %1228 = vmatprep.mubr.msk.f32.mxu1 %vm239_vm0, %v224_v10 }
  0x4b   : > { %1221 = vmatmul.mubr.msk.f32.gmra.mxu0 %vm239_vm0, %v229_v11 }
  0x4c   : > { %1229 = vmatmul.mubr.msk.f32.gmra.mxu1 %vm239_vm0, %v225_v12  ;;  %1233 = vmatprep.mubr.msk.f32.mxu0 %vm239_vm0, %v226_v3 }
  0x4d   : > { %1241 = vmatprep.mubr.msk.f32.mxu1 %vm239_vm0, %v222_v4 }
  0x4f   : > { %1234 = vmatmul.mubr.msk.f32.vlgmr.msra.gmra.mxu0 %vm239_vm0, %v227_v5 }
  0x50   : > { %1242 = vmatmul.mubr.msk.f32.vlgmr.msra.gmra.mxu1 %vm239_vm0, %v223_v6  ;;  %1236 = vmatprep.mubr.msk.f32.mxu0 %vm239_vm0, %v228_v9 }
  0x51   : > { %1244 = vmatprep.mubr.msk.f32.mxu1 %vm239_vm0, %v224_v10 }
  0x53   : > { %1237 = vmatmul.mubr.msk.f32.gmra.mxu0 %vm239_vm0, %v229_v11 }
  0x54   : > { %1245 = vmatmul.mubr.msk.f32.gmra.mxu1 %vm239_vm0, %v225_v12 }
  0xb9   : > { %v234_v34 = vpop.permute.xlu0 %233 }
  0xf7   : > { %v1187_v18 = vpop.f32.mrf.mxu0 }
  0xf8   : > { %v1195_v19 = vpop.f32.mrf.mxu1 }
  0xf9   : > { %v318_v20 = vpop.f32.mrf.mxu0  ;;  %v421_v25 = vadd.f32 %v1195_v19, %v1187_v18 }
  0xfa   : > { %v415_v21 = vpop.f32.mrf.mxu1 }
  0xfb   : > { %v416_v22 = vadd.f32 %v415_v21, %v318_v20  ;;  %v1190_v23 = vpop.f32.mrf.mxu0 }
  0xfc   : > { %v1198_v24 = vpop.f32.mrf.mxu1 }
  0xfd   : > { %v328_v26 = vpop.f32.mrf.mxu0  ;;  %v434_v28 = vmax.f32 %v416_v22, %v421_v25  ;;  %v431_v32 = vadd.f32 %v1198_v24, %v1190_v23 }
  0xfe   : > { %v425_v27 = vpop.f32.mrf.mxu1 }
  0xff   : > { %v426_v29 = vadd.f32 %v425_v27, %v328_v26  ;;  %v1203_v30 = vpop.f32.mrf.mxu0 }
 0x100   : > { %v1211_v31 = vpop.f32.mrf.mxu1 }
 0x101   : > { %v435_v33 = vmax.f32 %v434_v28, %v426_v29  ;;  %v508_v35 = vpop.f32.mrf.mxu0  ;;  %v599_v41 = vadd.f32 %v1211_v31, %v1203_v30 }
 0x102   : > { %v593_v36 = vpop.f32.mrf.mxu1 }
 0x103   : > { %v436_v37 = vmax.f32 %v435_v33, %v431_v32  ;;  %v594_v38 = vadd.f32 %v593_v36, %v508_v35  ;;  %v1206_v39 = vpop.f32.mrf.mxu0 }
 0x104   : > { %v1214_v40 = vpop.f32.mrf.mxu1 }
 0x105   : > { %v437_v42 = vadd.f32 %v436_v37, %v234_v34  ;;  %v518_v43 = vpop.f32.mrf.mxu0  ;;  %v612_v45 = vmax.f32 %v594_v38, %v599_v41  ;;  %v609_v49 = vadd.f32 %v1214_v40, %v1206_v39 }
 0x106   : > { %v603_v44 = vpop.f32.mrf.mxu1 }
 0x107   : > { %972 = vst [vmem:[%s1664_s27] sm:$0xff] %v437_v42  ;;  %v604_v46 = vadd.f32 %v603_v44, %v518_v43  ;;  %v1219_v47 = vpop.f32.mrf.mxu0 }
 0x108   : > { %v1227_v48 = vpop.f32.mrf.mxu1 }
 0x109   : > { %v613_v50 = vmax.f32 %v612_v45, %v604_v46  ;;  %v686_v51 = vpop.f32.mrf.mxu0  ;;  %v777_v58 = vadd.f32 %v1227_v48, %v1219_v47 }
 0x10a   : > { %v771_v52 = vpop.f32.mrf.mxu1 }
 0x10b   : > { %v614_v53 = vmax.f32 %v613_v50, %v609_v49  ;;  %v772_v54 = vadd.f32 %v771_v52, %v686_v51  ;;  %v1222_v55 = vpop.f32.mrf.mxu0 }
 0x10c   : > { %v1230_v56 = vpop.f32.mrf.mxu1 }
 0x10d   : > { %v615_v57 = vadd.f32 %v614_v53, %v234_v34  ;;  %v696_v59 = vpop.f32.mrf.mxu0  ;;  %v790_v61 = vmax.f32 %v772_v54, %v777_v58  ;;  %v787_v1 = vadd.f32 %v1230_v56, %v1222_v55 }
 0x10e   : > { %v781_v60 = vpop.f32.mrf.mxu1 }
 0x10f   : > { %973 = vst [vmem:[%s1664_s27 + $0x8] sm:$0xff] %v615_v57  ;;  %v782_v62 = vadd.f32 %v781_v60, %v696_v59  ;;  %v1235_v63 = vpop.f32.mrf.mxu0 }
 0x110   : > { %v1243_v0 = vpop.f32.mrf.mxu1 }
 0x111   : > { %v791_v2 = vmax.f32 %v790_v61, %v782_v62  ;;  %v864_v3 = vpop.f32.mrf.mxu0  ;;  %v955_v10 = vadd.f32 %v1243_v0, %v1235_v63 }
 0x112   : > { %v949_v4 = vpop.f32.mrf.mxu1 }
 0x113   : > { %v792_v5 = vmax.f32 %v791_v2, %v787_v1  ;;  %v950_v6 = vadd.f32 %v949_v4, %v864_v3  ;;  %v1238_v7 = vpop.f32.mrf.mxu0 }
 0x114   : > { %v1246_v8 = vpop.f32.mrf.mxu1 }
 0x115   : > { %v793_v9 = vadd.f32 %v792_v5, %v234_v34  ;;  %v874_v11 = vpop.f32.mrf.mxu0  ;;  %v968_v13 = vmax.f32 %v950_v6, %v955_v10  ;;  %v965_v15 = vadd.f32 %v1246_v8, %v1238_v7 }
 0x116   : > { %v959_v12 = vpop.f32.mrf.mxu1 }
 0x117   : > { %974 = vst [vmem:[%s1664_s27 + $0x10] sm:$0xff] %v793_v9  ;;  %v960_v14 = vadd.f32 %v959_v12, %v874_v11 }
 0x119   : > { %v969_v16 = vmax.f32 %v968_v13, %v960_v14 }
 0x11b   : > { %v970_v17 = vmax.f32 %v969_v16, %v965_v15 }
 0x11d   : > { %v971_v18 = vadd.f32 %v970_v17, %v234_v34 }
 0x11f   : > { %975 = vst [vmem:[%s1664_s27 + $0x18] sm:$0xff] %v971_v18 }
 0x120   : > { %1374 = shalt.err (!%p1371_p7)
}
 0x121   : > { %s1375_s21 = scalar_lea.hbm %s1677_s23, 512  ;;  %s1379_s20 = scalar_lea.hbm %s1734_s3, 2048 }
 0x122   : > { %p1376_p10 = scmp.ne.s32.totalorder %s1677_s23, %s1375_s21  ;;  %p1380_p13 = scmp.lt.s32.totalorder %s1677_s23, %s1734_s3 }
 0x123   : > { %p1381_p1 = scmp.lt.s32.totalorder %s1379_s20, %s1375_s21 }
 0x124   : > { %p1377_p11 = pnand %p1376_p10, %p1553_p9 }
 0x125   : > { %p1382_p8 = por %p1381_p1, %p1380_p13 }
 0x126   : > { %p1378_p3 = pneg %p1377_p11 }
 0x128   : > { %p1383_p0 = pnand %p1382_p8, %p1378_p3 }
 0x12a   : > { %1386 = shalt.err (!%p1383_p0)
}
 0x12b   : > { %s1465_s30 = smov 128   ;;  %s1466_s8 = smov 256  }
 0x12c   : > { %s1467_s16 = smov 8  }
 0x12d   : > { %1249 = dma.vmem_to_hbm [thread:$0]  (%p1553_p9), %s1672_s7, 512, %s1677_s23, %s977_s15, %s1465_s30, %s1466_s8, %s1467_s16  }
 0x12e PF: > { %p1260_p2 = scmp.ge.s32.totalorder %s1457_s19, 2  ;;  %s1009_s22 = sand.u32 1, %s1429_s12  }
 0x12f   : > { %s1010_s26 = scalar_lea.sflag [#allocation4], %s1009_s22 }
 0x130   : > { %p1256_p4 = pnand %p1260_p2, %p1559_p12 }
 0x132   : > { %p1257_p5 = pneg %p1256_p4 }
 0x134   : > { %1424 = dma.done.wait (%p1257_p5), %s1010_s26, 512  }
 0x135   : > { %1426 = vsyncadd (%p1257_p5), %s1010_s26, 4294966784  ;;  %s19_s19 = sadd.s32 1, %s1457_s19   ;;  %s1744_s28 = sld [smem:[#allocation8_spill]] }
 0x136   : > { %p16_p6 = scmp.ge.s32.totalorder %s19_s19, 6   ;;  %s1745_s5 = sld [smem:[#allocation9_spill]] }
 0x137   : > { %s1746_s12 = smov %s1433_s13  ;;  %s1747_s13 = smov %s1437_s14 }
 0x138   : > { %s1748_s14 = smov %s1566_s6  ;;  %s1749_s15 = smov %s1449_s17 }
 0x139   : > { %s1750_s16 = smov %s1453_s18  ;;  %18 = sbr.rel (!%p16_p6) target bundleno = 7 (0x7), region = 84 }
 0x13b   : > { %s1751_s17 = smov %s1744_s28 }
 0x13c   : > { %s1752_s18 = smov %s1745_s5 }
 0x13e   :  { %1015 = vsyncpa [#allocation3], 1 }
 0x13f   :  { %1017 = vsyncpa [#allocation3 + $0x1], 1 }
 0x140   :  { %1018 = vsyncpa [#allocation4], 1 }
 0x141   :  { %1020 = vsyncpa [#allocation4 + $0x1], 1 }

</bundles_post_ra>
